<compile_context>
chip_gen: v5e
topology: v5e:2x2
jax: 0.10.0
libtpu: 0.0.40
codegen_flags: <defaults>
</compile_context>

<pallas_src>
import math

import jax
import jax.numpy as jnp
from jax.experimental import pallas as pl
from jax.experimental.pallas import tpu as pltpu


def _dma_copy_kernel(x_ref, o_ref, sem):
    # Single whole-array HBM->HBM DMA; no compute, no VMEM staging.
    cp = pltpu.make_async_copy(x_ref, o_ref, sem)
    cp.start()
    cp.wait()


def _resolve_view_shape(batch: int, total: int, shape) -> tuple:
    """torch.view semantics for the trailing dims (at most one -1)."""
    shape = tuple(int(s) for s in shape)
    per_batch = total // batch if batch else 0
    if shape.count(-1) > 1:
        raise ValueError("only one dimension can be inferred (-1)")
    if -1 in shape:
        known = 1
        for s in shape:
            if s != -1:
                known *= s
        if known == 0 or per_batch % known != 0:
            raise ValueError(f"cannot infer -1 for shape {shape}")
        shape = tuple(per_batch // known if s == -1 else s for s in shape)
    if math.prod(shape) != per_batch:
        raise ValueError(
            f"shape {shape} is invalid for input with {per_batch} elements per batch row")
    return shape


def view(x: jax.Array, *shape, materialize: bool = True) -> jax.Array:
    """Pallas equivalent of `x.view(x.size(0), *shape)`."""
    N = x.shape[0]
    total = x.size
    out_dims = _resolve_view_shape(N, total, shape)
    out_shape = (N,) + out_dims

    # PyTorch view is metadata-only; skip the copy unless explicitly requested.
    if not materialize or total == 0:
        return x.reshape(out_shape)

    itemsize = jnp.dtype(x.dtype).itemsize

    copied = pl.pallas_call(
        _dma_copy_kernel,
        out_shape=jax.ShapeDtypeStruct(x.shape, x.dtype),
        in_specs=[pl.BlockSpec(memory_space=pl.ANY)],
        out_specs=pl.BlockSpec(memory_space=pl.ANY),
        scratch_shapes=[pltpu.SemaphoreType.DMA(())],
        cost_estimate=pl.CostEstimate(
            flops=0,
            transcendentals=0,
            bytes_accessed=2 * total * itemsize,
        ),
    )(x)

    # Metadata-only reshape of the freshly materialized (contiguous) copy.
    return copied.reshape(out_shape)


class View:
    """Mirror of the PyTorch module: View(*shape)(x) == x.view(x.size(0), *shape)."""

    def __init__(self, *shape) -> None:
        self.shape = shape

    def __call__(self, x: jax.Array) -> jax.Array:
        return view(x, *self.shape)


if __name__ == "__main__":
    key = jax.random.PRNGKey(0)
    x = jax.random.normal(key, (2, 4, 16, 16), dtype=jnp.float32)

    # (2, 4, 16, 16) -> (2, 16, 64), batch dim preserved.
    out = jax.block_until_ready(View(16, 64)(x))
    ref = x.reshape(2, 16, 64)
    assert out.shape == ref.shape and out.dtype == x.dtype
    assert jnp.array_equal(out, ref)

    # Flatten variant with inferred dim: (2, 4, 16, 16) -> (2, 1024).
    out2 = jax.block_until_ready(View(-1)(x))
    ref2 = x.reshape(2, 1024)
    assert out2.shape == ref2.shape
    assert jnp.array_equal(out2, ref2)

    # Ragged total (per-batch = 105, not a multiple of 128): DMA path has no
    # lane constraint, so no padding / extra HBM passes are needed.
    key2 = jax.random.PRNGKey(1)
    xr = jax.random.normal(key2, (2, 3, 5, 7), dtype=jnp.float32)
    out3 = jax.block_until_ready(View(-1)(xr))
    ref3 = xr.reshape(2, 105)
    assert out3.shape == ref3.shape
    assert jnp.array_equal(out3, ref3)

    # Packed dtype (bf16): (2, 4, 16, 16) -> (2, 4, 256).
    xb = x.astype(jnp.bfloat16)
    out4 = jax.block_until_ready(View(4, 256)(xb))
    ref4 = xb.reshape(2, 4, 256)
    assert out4.shape == ref4.shape and out4.dtype == jnp.bfloat16
    assert jnp.array_equal(out4, ref4)

    # Metadata-only fast path (no kernel launch).
    out5 = jax.block_until_ready(view(x, 16, 64, materialize=False))
    assert jnp.array_equal(out5, ref)

    print("KERNEL_OK")
</pallas_src>

<mosaic_0001>
module attributes {stable_mosaic.version = 11 : i64} {
  func.func @_dma_copy_kernel(%arg0: memref<2x4x16x16xf32, #tpu.memory_space<any>>, %arg1: memref<2x4x16x16xf32, #tpu.memory_space<any>>, %arg2: memref<!tpu.dma_semaphore, #tpu.memory_space<semaphore_mem>>) attributes {dimension_semantics = [], scalar_prefetch = 0 : i64, scratch_operands = 1 : i64, tpu.core_type = #tpu.core_type<tc>} {
    tpu.enqueue_dma source(%arg0 : memref<2x4x16x16xf32, #tpu.memory_space<any>>) target(%arg1 : memref<2x4x16x16xf32, #tpu.memory_space<any>>) target_semaphore(%arg2 : memref<!tpu.dma_semaphore, #tpu.memory_space<semaphore_mem>>)
    tpu.wait_dma2 semaphore(%arg2 : memref<!tpu.dma_semaphore, #tpu.memory_space<semaphore_mem>>) src(%arg0 : memref<2x4x16x16xf32, #tpu.memory_space<any>>) dst(%arg1 : memref<2x4x16x16xf32, #tpu.memory_space<any>>)
    return
  }
}

</mosaic_0001>

<bundles_post_ra>
// kernel: tpu_custom_call.1
= control target key start
LH: loop header
LB: loop body
LE: loop exit
PB: predicated region body
PF: predicated region fallthrough
CT: control target
= control target key end

     0   :  { %s34_s12 = smov [#allocation2]   ;;  %s35_s13 = smov [#allocation3]   ;;  %s53_s0 = inlined_call_operand.hbm [shape: f32[2,4,16,16], index: 0, kind: input, shape index: {}]   ;;  %s54_s1 = inlined_call_operand.hbm [shape: f32[2,4,16,16], index: 1, kind: output, shape index: {}]  }
   0x1   :  { %s10_s8 = sshll.u32 %s53_s0, 4  ;;  %s12_s11 = sshll.u32 %s54_s1, 4  ;;  %s11_s8 = int_to_ptr.hbm [resolvable:$true] %s10_s8  ;;  %s13_s11 = int_to_ptr.hbm [resolvable:$true] %s12_s11 }
   0x2   :  { %s36_s14 = smov 0  }
   0x3   :  { %16 = dma.general %s11_s8, 2048, %s13_s11, %s34_s12, %s35_s13, [#allocation4], %s36_s14, 0  }
   0x4   :  { %32 = dma.done.wait [#allocation2], 2048 }
   0x5   :  { %33 = vsyncadd [#allocation2], 4294965248 }
   0x6   :  { %22 = vsyncmov [#allocation2] }
   0x9   :  { %s23_s15 = vpop.sfrf %22 }
   0xa   :  { %p28_p0 = scmp.ne.s32.totalorder %s23_s15, 0 }
   0xc   :  { %27 = shalt.err (%p28_p0)  }

</bundles_post_ra>
